<compile_context>
chip_gen: v7x
topology: tpu7x:2x2x1
jax: 0.10.0
libtpu: 0.0.40
codegen_flags: <defaults>
</compile_context>

<pallas_src>
import functools

import jax
import jax.numpy as jnp
from jax import lax
from jax.experimental import pallas as pl
from jax.experimental.pallas import tpu as pltpu

_NEG_BIG = -1e30  # finite "minus infinity" (avoids inf-inf NaNs on masked data)


def _loss_kernel(x_ref, sel_ref, out_ref, m_sc, l_sc, *,
                 b_actual, d_actual, tb, td, chunk, d_ragged, b_ragged):
    """Streaming logsumexp over one (TB, TD) tile of x.

    x_ref  : (TB, TD) logits tile, native dtype (bf16/f32), in VMEM
    sel_ref: (TB, 1) f32 pre-gathered target logits x[b, target[b]]
    out_ref: (1, 8, 128) f32 lane-dense partial-sum block for this batch tile
    m_sc   : (TB, 1) f32 running max        (persists across the D grid axis)
    l_sc   : (TB, 1) f32 running sum of exp (persists across the D grid axis)
    """
    bi = pl.program_id(0)
    di = pl.program_id(1)
    n_chunks = td // chunk

    @pl.when(di == 0)
    def _init():
        m_sc[...] = jnp.full_like(m_sc, -jnp.inf)
        l_sc[...] = jnp.zeros_like(l_sc)

    if d_ragged:
        # Hoisted once per grid step; reused by every sub-chunk.
        col = lax.broadcasted_iota(jnp.int32, (tb, chunk), 1)
        tile_limit = d_actual - di * td  # valid columns left, from tile start

    def online_update(m, l, xc, limit):
        if d_ragged:
            xc = jnp.where(col < limit, xc, _NEG_BIG)
        m_new = jnp.maximum(m, jnp.max(xc, axis=-1, keepdims=True))
        l_new = l * jnp.exp(m - m_new) + jnp.sum(
            jnp.exp(xc - m_new), axis=-1, keepdims=True)
        return m_new, l_new

    # Single pass over the tile in lane-aligned sub-chunks: each chunk is
    # loaded in native dtype, widened to f32 once, and consumed by both the
    # max and the exp-sum before the next chunk is touched (static slices on
    # the VMEM ref are free; the (m, l) carry serializes the chunks).
    m, l = m_sc[...], l_sc[...]
    for c in range(n_chunks):
        xc = x_ref[:, c * chunk:(c + 1) * chunk].astype(jnp.float32)
        limit = (tile_limit - c * chunk) if d_ragged else None
        m, l = online_update(m, l, xc, limit)
    m_sc[...] = m
    l_sc[...] = l

    @pl.when(di == pl.num_programs(1) - 1)
    def _finalize():
        # per-sample CE loss for this batch tile: logsumexp - target logit
        losses = (m_sc[...] + jnp.log(l_sc[...])) - sel_ref[...]
        if b_ragged:
            # mask out-of-range batch rows (garbage data in the boundary block)
            row = lax.broadcasted_iota(jnp.int32, losses.shape, 0) + bi * tb
            losses = jnp.where(row < b_actual, losses, 0.0)
        # lane-dense partial-sum block; wrapper reads [:, 0, 0]
        out_ref[...] = jnp.full(out_ref.shape, jnp.sum(losses),
                                dtype=out_ref.dtype)


def _round_up(a, b):
    return (a + b - 1) // b * b


def loss_forward(x, target, *, max_tb=512, max_td=4096,
                 vmem_limit_bytes=48 * 1024 * 1024):
    """x: (B, D) float logits (f32/bf16), target: (B,) int -> scalar f32 mean CE."""
    B, D = x.shape
    max_tb = max(8, (max_tb // 8) * 8)
    max_td = max(128, (max_td // 128) * 128)

    # Gather the target logits on the wrapper side (B tiny reads) so the
    # kernel's inner loop carries no iota/compare/select work at all.
    idx = target.astype(jnp.int32).reshape(B, 1)
    sel = jnp.take_along_axis(x, idx, axis=1).astype(jnp.float32)   # (B, 1)

    # Batch tile: sublane-aligned; aim for >= 2 tiles so v7x megacore keeps
    # both TensorCores busy on the "parallel" axis.
    if B <= 8:
        tb = B
    else:
        tb = max(8, min(max_tb, _round_up(pl.cdiv(B, 2), 8)))
        tb = min(tb, (B // 8) * 8)

    # D tile: lane-aligned (or the full dim for tiny D); never exceeds D, so
    # no wrapper-side jnp.pad of x is needed (ragged tails masked in-kernel).
    if D <= 128:
        td = D
    else:
        td = min(max_td, (D // 128) * 128)

    # Lane-aligned sub-chunk that divides td (single widen pass per chunk).
    if td % 128 == 0:
        chunk = next(c for c in (512, 384, 256, 128) if td % c == 0)
    else:
        chunk = td

    num_bt = pl.cdiv(B, tb)
    num_dt = pl.cdiv(D, td)
    d_ragged = (D % td) != 0
    b_ragged = (B % tb) != 0

    kernel = functools.partial(
        _loss_kernel, b_actual=B, d_actual=D, tb=tb, td=td, chunk=chunk,
        d_ragged=d_ragged, b_ragged=b_ragged)

    out_shape = jax.ShapeDtypeStruct((num_bt, 8, 128), jnp.float32)
    cost = pl.CostEstimate(
        flops=3 * B * D,
        transcendentals=B * D,
        bytes_accessed=(x.size * x.dtype.itemsize + sel.size * 4
                        + num_bt * 8 * 128 * 4))

    out = pl.pallas_call(
        kernel,
        out_shape=out_shape,
        grid_spec=pltpu.PrefetchScalarGridSpec(
            num_scalar_prefetch=0,
            grid=(num_bt, num_dt),
            in_specs=[
                # x: (TB, TD) tile, streamed & double-buffered, native dtype
                pl.BlockSpec((tb, td), lambda bi, di: (bi, di)),
                # pre-gathered target logits: TB values per pipeline step
                pl.BlockSpec((tb, 1), lambda bi, di: (bi, 0)),
            ],
            # per-batch-tile partial sum; resident across the D (reduction) axis
            out_specs=pl.BlockSpec((1, 8, 128), lambda bi, di: (bi, 0, 0)),
            scratch_shapes=[pltpu.VMEM((tb, 1), jnp.float32)] * 2,
        ),
        compiler_params=pltpu.CompilerParams(
            dimension_semantics=("parallel", "arbitrary"),
            vmem_limit_bytes=vmem_limit_bytes),
        cost_estimate=cost,
    )(x, sel)

    # Finish the mean: sum of per-tile partial sums divided by the true B, once.
    return jnp.sum(out[:, 0, 0]) / B


if __name__ == "__main__":
    key = jax.random.PRNGKey(0)
    kx1, kt1, kx2, kt2, kx3, kt3 = jax.random.split(key, 6)

    def ref_loss(x, t):
        xf = x.astype(jnp.float32)
        tgt = jnp.take_along_axis(xf, t.reshape(-1, 1).astype(jnp.int32), axis=1)[:, 0]
        return jnp.mean(jax.nn.logsumexp(xf, axis=-1) - tgt)

    # Test 1: tiny single-tile path (batch=8, embedding_dim=32; full-dim D block)
    B1, D1 = 8, 32
    x1 = jax.random.normal(kx1, (B1, D1), dtype=jnp.float32)
    t1 = jax.random.randint(kt1, (B1,), 0, D1, dtype=jnp.int32)
    loss1 = loss_forward(x1, t1)
    jax.block_until_ready(loss1)
    assert jnp.allclose(loss1, ref_loss(x1, t1), rtol=1e-5, atol=1e-5), loss1

    # Test 2: ragged B and D (3 batch tiles x 3 D tiles), in-kernel tail masking
    B2, D2 = 20, 300
    x2 = jax.random.normal(kx2, (B2, D2), dtype=jnp.float32)
    t2 = jax.random.randint(kt2, (B2,), 0, D2, dtype=jnp.int32)
    loss2 = loss_forward(x2, t2, max_tb=8, max_td=128)
    jax.block_until_ready(loss2)
    assert jnp.allclose(loss2, ref_loss(x2, t2), rtol=1e-5, atol=1e-5), loss2

    # Test 3: multi-chunk single-pass path (td=1536 -> 3 chunks of 512), 2 batch tiles
    B3, D3 = 48, 1536
    x3 = jax.random.normal(kx3, (B3, D3), dtype=jnp.float32)
    t3 = jax.random.randint(kt3, (B3,), 0, D3, dtype=jnp.int32)
    loss3 = loss_forward(x3, t3)
    jax.block_until_ready(loss3)
    assert jnp.allclose(loss3, ref_loss(x3, t3), rtol=1e-5, atol=1e-5), loss3

    # Test 4: bf16 on the wire (no wrapper upcast of x), f32 accumulation in-kernel
    x4 = x2.astype(jnp.bfloat16)
    loss4 = loss_forward(x4, t2, max_tb=8, max_td=128)
    jax.block_until_ready(loss4)
    assert jnp.allclose(loss4, ref_loss(x4, t2), rtol=1e-4, atol=1e-4), loss4

    print("KERNEL_OK")
</pallas_src>

<mosaic_0001>
module attributes {stable_mosaic.version = 11 : i64} {
  func.func @_loss_kernel(%arg0: i32, %arg1: i32, %arg2: memref<8x32xf32, #tpu.memory_space<vmem>>, %arg3: memref<8x1xf32, #tpu.memory_space<vmem>>, %arg4: memref<1x8x128xf32, #tpu.memory_space<vmem>>, %arg5: memref<8x1xf32, #tpu.memory_space<vmem>>, %arg6: memref<8x1xf32, #tpu.memory_space<vmem>>) attributes {dimension_semantics = [#tpu.dimension_semantics<parallel>, #tpu.dimension_semantics<arbitrary>], iteration_bounds = array<i64: 1, 1>, scalar_prefetch = 0 : i64, scratch_operands = 2 : i64, tpu.core_type = #tpu.core_type<tc>, window_params = [{transform_indices = @transform_0, window_bounds = array<i64: 8, 32>}, {transform_indices = @transform_1, window_bounds = array<i64: 8, 1>}, {transform_indices = @transform_2, window_bounds = array<i64: 1, 8, 128>}]} {
    %c0_i32 = arith.constant 0 : i32
    %0 = arith.cmpi eq, %arg1, %c0_i32 : i32
    %1 = arith.extui %0 : i1 to i32
    %c0_i32_0 = arith.constant 0 : i32
    %2 = arith.cmpi ne, %1, %c0_i32_0 : i32
    scf.if %2 {
      %cst_13 = arith.constant 0xFF800000 : f32
      %23 = vector.broadcast %cst_13 : f32 to vector<8x1xf32>
      %c0_14 = arith.constant 0 : index
      %c0_15 = arith.constant 0 : index
      %24 = vector.load %arg5[%c0_14, %c0_15] : memref<8x1xf32, #tpu.memory_space<vmem>>, vector<8x1xf32>
      tpu.vector_store %arg5[%c0_14, %c0_15], %23 {strides = array<i32>} : memref<8x1xf32, #tpu.memory_space<vmem>>, vector<8x1xf32>,
      %cst_16 = arith.constant 0.000000e+00 : f32
      %25 = vector.broadcast %cst_16 : f32 to vector<8x1xf32>
      %c0_17 = arith.constant 0 : index
      %c0_18 = arith.constant 0 : index
      %26 = vector.load %arg6[%c0_17, %c0_18] : memref<8x1xf32, #tpu.memory_space<vmem>>, vector<8x1xf32>
      tpu.vector_store %arg6[%c0_17, %c0_18], %25 {strides = array<i32>} : memref<8x1xf32, #tpu.memory_space<vmem>>, vector<8x1xf32>,
    } else {
    }
    %c0 = arith.constant 0 : index
    %c0_1 = arith.constant 0 : index
    %3 = vector.load %arg5[%c0, %c0_1] : memref<8x1xf32, #tpu.memory_space<vmem>>, vector<8x1xf32>
    %c0_2 = arith.constant 0 : index
    %c0_3 = arith.constant 0 : index
    %4 = vector.load %arg6[%c0_2, %c0_3] : memref<8x1xf32, #tpu.memory_space<vmem>>, vector<8x1xf32>
    %c0_4 = arith.constant 0 : index
    %c0_5 = arith.constant 0 : index
    %5 = vector.load %arg2[%c0_4, %c0_5] : memref<8x32xf32, #tpu.memory_space<vmem>>, vector<8x32xf32>
    %cst = arith.constant dense<0xFF800000> : vector<8xf32>
    %6 = vector.multi_reduction <maximumf>, %5, %cst [1] : vector<8x32xf32> to vector<8xf32>
    %7 = vector.shape_cast %6 : vector<8xf32> to vector<8x1xf32>
    %8 = arith.maximumf %3, %7 : vector<8x1xf32>
    %9 = arith.subf %3, %8 : vector<8x1xf32>
    %10 = math.exp %9 : vector<8x1xf32>
    %11 = arith.mulf %4, %10 : vector<8x1xf32>
    %12 = vector.broadcast %8 : vector<8x1xf32> to vector<8x32xf32>
    %13 = arith.subf %5, %12 : vector<8x32xf32>
    %14 = math.exp %13 : vector<8x32xf32>
    %cst_6 = arith.constant dense<0.000000e+00> : vector<8xf32>
    %15 = vector.multi_reduction <add>, %14, %cst_6 [1] : vector<8x32xf32> to vector<8xf32>
    %16 = vector.shape_cast %15 : vector<8xf32> to vector<8x1xf32>
    %17 = arith.addf %11, %16 : vector<8x1xf32>
    %c0_7 = arith.constant 0 : index
    %c0_8 = arith.constant 0 : index
    %18 = vector.load %arg5[%c0_7, %c0_8] : memref<8x1xf32, #tpu.memory_space<vmem>>, vector<8x1xf32>
    tpu.vector_store %arg5[%c0_7, %c0_8], %8 {strides = array<i32>} : memref<8x1xf32, #tpu.memory_space<vmem>>, vector<8x1xf32>,
    %c0_9 = arith.constant 0 : index
    %c0_10 = arith.constant 0 : index
    %19 = vector.load %arg6[%c0_9, %c0_10] : memref<8x1xf32, #tpu.memory_space<vmem>>, vector<8x1xf32>
    tpu.vector_store %arg6[%c0_9, %c0_10], %17 {strides = array<i32>} : memref<8x1xf32, #tpu.memory_space<vmem>>, vector<8x1xf32>,
    %c0_i32_11 = arith.constant 0 : i32
    %20 = arith.cmpi eq, %arg1, %c0_i32_11 : i32
    %21 = arith.extui %20 : i1 to i32
    %c0_i32_12 = arith.constant 0 : i32
    %22 = arith.cmpi ne, %21, %c0_i32_12 : i32
    scf.if %22 {
      %c0_13 = arith.constant 0 : index
      %c0_14 = arith.constant 0 : index
      %23 = vector.load %arg5[%c0_13, %c0_14] : memref<8x1xf32, #tpu.memory_space<vmem>>, vector<8x1xf32>
      %c0_15 = arith.constant 0 : index
      %c0_16 = arith.constant 0 : index
      %24 = vector.load %arg6[%c0_15, %c0_16] : memref<8x1xf32, #tpu.memory_space<vmem>>, vector<8x1xf32>
      %25 = math.log %24 : vector<8x1xf32>
      %26 = arith.addf %23, %25 : vector<8x1xf32>
      %c0_17 = arith.constant 0 : index
      %c0_18 = arith.constant 0 : index
      %27 = vector.load %arg3[%c0_17, %c0_18] : memref<8x1xf32, #tpu.memory_space<vmem>>, vector<8x1xf32>
      %28 = arith.subf %26, %27 : vector<8x1xf32>
      %29 = vector.shape_cast %28 : vector<8x1xf32> to vector<1x8x1xf32>
      %cst_19 = arith.constant dense<0.000000e+00> : vector<1xf32>
      %30 = vector.multi_reduction <add>, %29, %cst_19 [1, 2] : vector<1x8x1xf32> to vector<1xf32>
      %31 = vector.shape_cast %30 : vector<1xf32> to vector<1x1x1xf32>
      %32 = vector.extract %31[0, 0, 0] : f32 from vector<1x1x1xf32>
      %33 = vector.broadcast %32 : f32 to vector<1x8x128xf32>
      %c0_20 = arith.constant 0 : index
      %c0_21 = arith.constant 0 : index
      %c0_22 = arith.constant 0 : index
      %34 = vector.load %arg4[%c0_20, %c0_21, %c0_22] : memref<1x8x128xf32, #tpu.memory_space<vmem>>, vector<1x8x128xf32>
      tpu.vector_store %arg4[%c0_20, %c0_21, %c0_22], %33 {strides = array<i32>} : memref<1x8x128xf32, #tpu.memory_space<vmem>>, vector<1x8x128xf32>,
    } else {
    }
    return
  }
  func.func @transform_0(%arg0: i32, %arg1: i32) -> (i32, i32) {
    %c0_i32 = arith.constant 0 : i32
    return %arg0, %arg1 : i32, i32
  }
  func.func @transform_1(%arg0: i32, %arg1: i32) -> (i32, i32) {
    %c0_i32 = arith.constant 0 : i32
    %c0_i32_0 = arith.constant 0 : i32
    return %arg0, %c0_i32 : i32, i32
  }
  func.func @transform_2(%arg0: i32, %arg1: i32) -> (i32, i32, i32) {
    %c0_i32 = arith.constant 0 : i32
    %c0_i32_0 = arith.constant 0 : i32
    %c0_i32_1 = arith.constant 0 : i32
    return %arg0, %c0_i32, %c0_i32_0 : i32, i32, i32
  }
}

</mosaic_0001>

<bundles_post_ra>
// kernel: tpu_custom_call.1
= control target key start
LH: loop header
LB: loop body
LE: loop exit
PB: predicated region body
PF: predicated region fallthrough
CT: control target
= control target key end

     0   :  { %vm22_vm0 = vcmask 261120   ;;  %s163_s0 = inlined_call_operand.vmem [shape: f32[8,32], index: 0, kind: input, shape index: {}]   ;;  %s164_s1 = inlined_call_operand.vmem [shape: f32[8,1], index: 1, kind: input, shape index: {}]   ;;  %s165_s2 = inlined_call_operand.hbm [shape: f32[1,8,128], index: 2, kind: output, shape index: {}]  }
   0x1   :  { %v21_v0 = vld [vmem:[%s163_s0] sm:$0xff] }
   0x2   :  { %7 = vsyncpa [#allocation5], 0  ;;  %v23_v1 = vsel %vm22_vm0, %v21_v0, -inf  ;;  %vm16_vm1 = vcmask 7168   ;;  %v119_v2 = vmov -inf   ;;  %v120_v3 = vmov 0  }
   0x3   :  { %24 = vmax.xlane.f32.xlu0 %v23_v1  ;;  %17 = vst.msk [vmem:[#allocation2] sm:$0xff] %vm16_vm1, %v119_v2  ;;  %v121_v4 = vmov 0.0   ;;  %v54_v24 = vld [vmem:[%s164_s1] sm:$0xff]  ;;  %s122_s12 = smov [#allocation4]  }
   0x4   :  { %88 = vset.pattern.permute.xlu0 %v120_v3  ;;  %18 = vst.msk [vmem:[#allocation3] sm:$0xff] %vm16_vm1, %v121_v4  ;;  %s74_s13 = sshll.u32 %s122_s12, 4  ;;  %s75_s13 = int_to_ptr.vmem [resolvable:$true] %s74_s13 }
   0x5   :  { %s95_s1 = scalar_lea.vmem %s75_s13, 128  ;;  %p100_p1 = scmp.lt.s32.totalorder %s75_s13, %s75_s13 }
   0x6   :  { %p96_p0 = scmp.ne.s32.totalorder %s75_s13, %s95_s1  ;;  %p101_p2 = scmp.lt.s32.totalorder %s95_s1, %s95_s1 }
   0x8   :  { %p102_p3 = por %p101_p2, %p100_p1 }
   0xa   :  { %v19_v5 = vld [vmem:[#allocation2] sm:$0xff]  ;;  %p103_p4 = pnand %p102_p3, %p96_p0 }
   0xb   :  { %v20_v16 = vld [vmem:[#allocation3] sm:$0xff] }
  0x90   :  { %v25_v6 = vpop.xlane.xlu0 %24 }
  0x91   :  { %v26_v7 = vmax.f32 %v19_v5, %v25_v6 }
  0x93   :  { %v27_v8 = vsub.f32 %v19_v5, %v26_v7  ;;  %44 = vst.msk [vmem:[#allocation2] sm:$0xff] %vm16_vm1, %v26_v7  ;;  %33 = vperm.xlu0 %88, %v26_v7  }
  0x95   :  { %v28_v14 = vmul.f32 1.442695, %v27_v8 }
  0x9a   :  { %v49_v23 = vld [vmem:[#allocation2] sm:$0xff] }
 0x112   :  { %v34_v9 = vpop.permute.xlu0 %33 }
 0x113   :  { %v36_v10 = vsub.f32 %v21_v0, %v34_v9 }
 0x115   :  { %v37_v11 = vmul.f32 1.442695, %v36_v10 }
 0x117   :  { %89 = vpow2.f32 %v37_v11 }
 0x118   :  { %91 = vpow2.f32 %v28_v14 }
 0x121   :  { %v90_v12 = vpop.eup %89 }
 0x122   :  { %v39_v13 = vsel %vm22_vm0, %v90_v12, 0.0  ;;  %v92_v15 = vpop.eup %91 }
 0x123   :  { %40 = vadd.xlane.f32.xlu1 %v39_v13  ;;  %v30_v17 = vmul.f32 %v92_v15, %v20_v16 }
 0x1b0   :  { %v41_v18 = vpop.xlane.xlu1 %40 }
 0x1b1   :  { %v42_v19 = vadd.f32 %v41_v18, %v30_v17 }
 0x1b3   :  { %45 = vst.msk [vmem:[#allocation3] sm:$0xff] %vm16_vm1, %v42_v19 }
 0x1ba   :  { %v50_v20 = vld [vmem:[#allocation3] sm:$0xff] }
 0x1bb   :  { %93 = vlog2.f32 %v50_v20 }
 0x1c5   :  { %v94_v21 = vpop.eup %93 }
 0x1c6   :  { %v52_v22 = vmul.f32 0.6931472, %v94_v21 }
 0x1c8   :  { %v53_v25 = vadd.f32 %v52_v22, %v49_v23 }
 0x1ca   :  { %v55_v26 = vsub.f32 %v53_v25, %v54_v24 }
 0x1cc   :  { %v56_v27 = vsel %vm16_vm1, %v55_v26, 0.0 }
 0x1cd   :  { %57 = vadd.xlane.f32.xlu1 %v56_v27 }
 0x25a   :  { %v58_v28 = vpop.xlane.xlu1 %57 }
 0x25b   :  { %v59_v29 = vrot.slane %v58_v28, 4 }
 0x25d   :  { %v60_v30 = vadd.f32 %v59_v29, %v58_v28 }
 0x25f   :  { %v61_v31 = vrot.slane %v60_v30, 2 }
 0x261   :  { %v62_v32 = vadd.f32 %v61_v31, %v60_v30 }
 0x263   :  { %v63_v33 = vrot.slane %v62_v32, 1 }
 0x265   :  { %v64_v34 = vadd.f32 %v63_v33, %v62_v32 }
 0x267   :  { %82 = vpush %v64_v34 }
 0x298   :  { %s83_s14 = spop %82 }
 0x299   :  { %v66_v35 = vstv %s83_s14 }
 0x29a   :  { %67 = vst [vmem:[#allocation4] sm:$0xff] %v66_v35 }
 0x29b   :  { %106 = shalt.err (!%p103_p4)
}
 0x29c   :  { %s107_s17 = scalar_lea.hbm %s165_s2, 128 }
 0x29d   :  { %p108_p5 = scmp.ne.s32.totalorder %s165_s2, %s107_s17  ;;  %p111_p6 = scmp.lt.u32.totalorder %s107_s17, %s165_s2 }
 0x29f   :  { %p113_p7 = pnand %p111_p6, %p108_p5 }
 0x2a1   :  { %116 = shalt.err (!%p113_p7)
}
 0x2a2   :  { %77 = dma.vmem_to_hbm [thread:$0]  %s75_s13, 128, %s165_s2, [#allocation5]  }
 0x2a3   :  { %117 = dma.done.wait [#allocation5], 128  }
 0x2a4   :  { %118 = vsyncadd [#allocation5], 4294967168 }
 0x2a5   :  { %81 = vsyncpa [#allocation5], 1 }

</bundles_post_ra>
